<compile_context>
chip_gen: v7x
topology: tpu7x:2x2x1
jax: 0.10.0
libtpu: 0.0.40
codegen_flags: <defaults>
</compile_context>

<pallas_src>
import functools

import jax
import jax.numpy as jnp
from jax import lax
from jax.experimental import pallas as pl
from jax.experimental.pallas import tpu as pltpu

_EPS = 1e-6


def _round_up(x, m):
    return -(-x // m) * m


def _vmem_capacity_bytes():
    """Per-TensorCore VMEM capacity; conservative fallback (v7x = 64 MiB)."""
    try:
        return int(pltpu.get_tpu_info().vmem_capacity_bytes)
    except Exception:
        return 64 * 1024 * 1024


def _vmem_limit_bytes(cap):
    # 3/4 of physical: ~48 MiB on v7x (64 MiB/TC), ~96 MiB on v5e/v6e (128 MiB).
    return int((cap * 3) // 4)


def _choose_tk(n, k, itemsize, vmem_limit):
    """Largest lane-aligned (multiple of 128) K tile whose double-buffered X
    block fits in the VMEM limit after subtracting the resident output blocks."""
    sub = max(8, 32 // itemsize)          # sublane packing: f32 -> 8, bf16 -> 16
    n_sub = _round_up(n, 8)
    n_lane = _round_up(n, 128)
    n_x = _round_up(n, sub)
    # double-buffered (N,N) Gram block + (N,128) row-sum block outputs
    resident = 2 * (n_sub * n_lane * 4 + n_sub * 128 * 4)
    budget = vmem_limit - resident - (2 << 20)      # misc slack
    if budget < 2 * n_x * 128 * itemsize:
        # TODO(synk): add an N-tiled (tn x tn Gram block) path for very large N.
        raise ValueError(
            f"N={n} too large for a single resident NxN Gram block in VMEM "
            f"(limit={vmem_limit} bytes); N-tiling not implemented.")
    max_tk = (budget // (2 * n_x * itemsize)) // 128 * 128
    return int(max(128, min(max_tk, _round_up(k, 128))))


# ---------------------------------------------------------------------------
# Kernel: per-split partial Gram + lane-partial row sums
#   X (N, K) -> S (num_splits, N, N), RS (num_splits, N, 128)
# ---------------------------------------------------------------------------
def _partial_gram_kernel(x_ref, s_ref, rs_ref, *, k_true, tk, ragged):
    kt = pl.program_id(1)

    @pl.when(kt == 0)
    def _():
        s_ref[...] = jnp.zeros_like(s_ref)
        rs_ref[...] = jnp.zeros_like(rs_ref)

    x = x_ref[...]
    if ragged:
        # Mask lanes past the true K.  Covers both the partial edge tile and
        # any fully-out-of-range (index-clamped) tile of the last split.
        j = pl.program_id(0) * pl.num_programs(1) + kt
        rem = k_true - j * tk
        lane = lax.broadcasted_iota(jnp.int32, x.shape, 1)
        x = jnp.where(lane < rem, x, jnp.zeros_like(x))

    # Uncentered Gram on the MXU: contract the lane dim of both operands
    # (no explicit transpose), f32 accumulation into the resident out block.
    s_ref[...] += lax.dot_general(
        x, x, dimension_numbers=(((1,), (1,)), ((), ())),
        preferred_element_type=jnp.float32)

    # Lane-partial row sums: VPU adds over 128-lane sub-blocks of the tile.
    # The single cross-lane reduce happens in the jnp finalize outside.
    n = x.shape[0]
    rs_ref[...] += x.astype(jnp.float32).reshape(n, tk // 128, 128).sum(axis=1)


def partial_gram(x2d, tk=None):
    n, k = x2d.shape
    cap = _vmem_capacity_bytes()
    vlim = _vmem_limit_bytes(cap)
    if tk is None:
        tk = _choose_tk(n, k, x2d.dtype.itemsize, vlim)
    if tk % 128 != 0:
        raise ValueError("tk must be a multiple of 128")

    total_tiles = max(1, -(-k // tk))
    num_splits = 2 if total_tiles >= 2 else 1        # split-K over v7x's 2 TCs
    grid_k = -(-total_tiles // num_splits)
    ragged = (k % tk != 0) or (total_tiles % num_splits != 0)
    last_tile = total_tiles - 1

    def x_map(sp, kt):
        # Contiguous split of K tiles per core; clamp to the last in-range tile
        # (clamped duplicates are fully masked out inside the kernel).
        return (0, jnp.minimum(sp * grid_k + kt, last_tile))

    kern = functools.partial(_partial_gram_kernel, k_true=k, tk=tk,
                             ragged=ragged)
    return pl.pallas_call(
        kern,
        out_shape=(jax.ShapeDtypeStruct((num_splits, n, n), jnp.float32),
                   jax.ShapeDtypeStruct((num_splits, n, 128), jnp.float32)),
        grid=(num_splits, grid_k),
        in_specs=[pl.BlockSpec((n, tk), x_map)],
        out_specs=(pl.BlockSpec((None, n, n), lambda sp, kt: (sp, 0, 0)),
                   pl.BlockSpec((None, n, 128), lambda sp, kt: (sp, 0, 0))),
        compiler_params=pltpu.CompilerParams(
            dimension_semantics=("parallel", "arbitrary"),
            vmem_limit_bytes=vlim),
        cost_estimate=pl.CostEstimate(
            flops=2 * n * n * k,
            transcendentals=0,
            bytes_accessed=(n * k * x2d.dtype.itemsize
                            + num_splits * (n * n + n * 128) * 4)),
    )(x2d)


# ---------------------------------------------------------------------------
# Tiny O(N^2) finalize in plain jnp (per review: combine split-K partials and
# assemble mean / centered Gram / loss outside the kernel).
# ---------------------------------------------------------------------------
def _finalize_stats(s_parts, rs_parts, k):
    S = jnp.sum(s_parts, axis=0)                                  # (N, N)
    rowsum = jnp.sum(jnp.sum(rs_parts, axis=0), axis=1, keepdims=True)  # (N, 1)
    kf = jnp.float32(k)
    m = rowsum / kf
    n = S.shape[0]
    G = (S - kf * (m * m.T) + _EPS * jnp.eye(n, dtype=jnp.float32)) / kf
    return m, G


def gram_stats(x2d, tk=None):
    n, k = x2d.shape
    s_parts, rs_parts = partial_gram(x2d, tk=tk)
    return _finalize_stats(s_parts, rs_parts, k)


def tex_loss(x2d, target_g, target_m, b_channels, tk=None):
    m, g = gram_stats(x2d, tk=tk)
    dg = g - target_g
    dm = m - target_m
    total = jnp.sum(dg * dg) + jnp.sum(dm * dm)       # 'sum' reduction MSE
    return total / jnp.float32(b_channels * b_channels)


# ---------------------------------------------------------------------------
# Module-like wrapper mirroring TexLossMeanCov
# ---------------------------------------------------------------------------
class TexLossMeanCovPallas:
    def __init__(self, target_feature, cast_to_bf16=False):
        a, b, c, d = target_feature.shape
        self._cast = cast_to_bf16
        X = target_feature.reshape(a * b, c * d)
        if cast_to_bf16:
            # Optional bandwidth optimization (kernel is HBM-bound for typical
            # N); accumulation stays f32. Verify numerics for your features.
            X = X.astype(jnp.bfloat16)
        self.targetM, self.targetG = gram_stats(X)    # (N,1), (N,N) f32
        self.loss = None

    def __call__(self, x):
        a, b, c, d = x.shape
        X = x.reshape(a * b, c * d)
        if self._cast:
            X = X.astype(jnp.bfloat16)
        self.loss = tex_loss(X, self.targetG, self.targetM, b)
        return x  # forward passes the input through unchanged


# ---------------------------------------------------------------------------
# Pure-JAX reference for correctness checks
# ---------------------------------------------------------------------------
def _ref_loss(x, tgt):
    a, b, c, d = x.shape
    X = x.reshape(a * b, c * d).astype(jnp.float32)
    Xt = tgt.reshape(a * b, c * d).astype(jnp.float32)
    M = X.mean(1)
    Mt = Xt.mean(1)
    Xc = X - M[:, None]
    Xct = Xt - Mt[:, None]
    G = (Xc @ Xc.T + _EPS * jnp.eye(a * b)) / (c * d)
    Gt = (Xct @ Xct.T + _EPS * jnp.eye(a * b)) / (c * d)
    return (jnp.sum((G - Gt) ** 2) + jnp.sum((M - Mt) ** 2)) / (b * b)


if __name__ == "__main__":
    key = jax.random.PRNGKey(0)
    k_tgt, k_in, k_rag = jax.random.split(key, 3)

    # small NCHW shapes: a=2, b=4, c=16, d=16 -> X is (8, 256)
    target_feature = jax.random.normal(k_tgt, (2, 4, 16, 16), dtype=jnp.float32)
    x = jax.random.normal(k_in, (2, 4, 16, 16), dtype=jnp.float32)

    mod = TexLossMeanCovPallas(target_feature)
    out = mod(x)
    jax.block_until_ready(out)
    loss_auto = jax.block_until_ready(mod.loss)

    ref = _ref_loss(x, target_feature)
    assert jnp.allclose(loss_auto, ref, rtol=1e-4, atol=1e-5), (loss_auto, ref)
    assert out.shape == x.shape and out.dtype == x.dtype

    # Explicitly exercise the split-K path (tk=128 -> 2 tiles -> 2 'parallel'
    # splits, each accumulating its own partial Gram).
    Xt2d = target_feature.reshape(8, 256)
    Mref = Xt2d.mean(1)
    Gref = (((Xt2d - Mref[:, None]) @ (Xt2d - Mref[:, None]).T
             + _EPS * jnp.eye(8)) / 256.0)
    m_tiled, g_tiled = gram_stats(Xt2d, tk=128)
    assert jnp.allclose(m_tiled[:, 0], Mref, rtol=1e-4, atol=1e-5)
    assert jnp.allclose(g_tiled, Gref, rtol=1e-4, atol=1e-5)

    X2d = x.reshape(8, 256)
    loss_tiled = jax.block_until_ready(
        tex_loss(X2d, mod.targetG, mod.targetM, 4, tk=128))
    assert jnp.allclose(loss_tiled, ref, rtol=1e-4, atol=1e-5), (loss_tiled, ref)

    # Ragged-K path: K=300 (not a multiple of 128), tk=128 -> 3 tiles over 2
    # splits -> masked partial edge tile + a fully-masked clamped tile.
    Xr = jax.random.normal(k_rag, (8, 300), dtype=jnp.float32)
    Mr = Xr.mean(1)
    Gr = (((Xr - Mr[:, None]) @ (Xr - Mr[:, None]).T
           + _EPS * jnp.eye(8)) / 300.0)
    mr, gr = gram_stats(Xr, tk=128)
    assert jnp.allclose(mr[:, 0], Mr, rtol=1e-4, atol=1e-5)
    assert jnp.allclose(gr, Gr, rtol=1e-4, atol=1e-5)

    print("KERNEL_OK")
</pallas_src>

<mosaic_0001>
module attributes {stable_mosaic.version = 11 : i64} {
  func.func @_partial_gram_kernel(%arg0: i32, %arg1: i32, %arg2: memref<8x256xf32, #tpu.memory_space<vmem>>, %arg3: memref<1x8x8xf32, #tpu.memory_space<vmem>>, %arg4: memref<1x8x128xf32, #tpu.memory_space<vmem>>) attributes {dimension_semantics = [#tpu.dimension_semantics<parallel>, #tpu.dimension_semantics<arbitrary>], iteration_bounds = array<i64: 1, 1>, scalar_prefetch = 0 : i64, scratch_operands = 0 : i64, tpu.core_type = #tpu.core_type<tc>, window_params = [{transform_indices = @transform_0, window_bounds = array<i64: 8, 256>}, {transform_indices = @transform_1, window_bounds = array<i64: 1, 8, 8>}, {transform_indices = @transform_2, window_bounds = array<i64: 1, 8, 128>}]} {
    %c0_i32 = arith.constant 0 : i32
    %0 = arith.cmpi eq, %arg1, %c0_i32 : i32
    %1 = arith.extui %0 : i1 to i32
    %c0_i32_0 = arith.constant 0 : i32
    %2 = arith.cmpi ne, %1, %c0_i32_0 : i32
    scf.if %2 {
      %cst_15 = arith.constant 0.000000e+00 : f32
      %19 = vector.broadcast %cst_15 : f32 to vector<8x8xf32>
      %c0_16 = arith.constant 0 : index
      %c0_17 = arith.constant 0 : index
      %c0_18 = arith.constant 0 : index
      %20 = vector.load %arg3[%c0_16, %c0_17, %c0_18] : memref<1x8x8xf32, #tpu.memory_space<vmem>>, vector<1x8x8xf32>
      %21 = vector.shape_cast %20 : vector<1x8x8xf32> to vector<8x8xf32>
      %22 = vector.shape_cast %19 : vector<8x8xf32> to vector<1x8x8xf32>
      tpu.vector_store %arg3[%c0_16, %c0_17, %c0_18], %22 {strides = array<i32>} : memref<1x8x8xf32, #tpu.memory_space<vmem>>, vector<1x8x8xf32>,
      %cst_19 = arith.constant 0.000000e+00 : f32
      %23 = vector.broadcast %cst_19 : f32 to vector<8x128xf32>
      %c0_20 = arith.constant 0 : index
      %c0_21 = arith.constant 0 : index
      %c0_22 = arith.constant 0 : index
      %24 = vector.load %arg4[%c0_20, %c0_21, %c0_22] : memref<1x8x128xf32, #tpu.memory_space<vmem>>, vector<1x8x128xf32>
      %25 = vector.shape_cast %24 : vector<1x8x128xf32> to vector<8x128xf32>
      %26 = vector.shape_cast %23 : vector<8x128xf32> to vector<1x8x128xf32>
      tpu.vector_store %arg4[%c0_20, %c0_21, %c0_22], %26 {strides = array<i32>} : memref<1x8x128xf32, #tpu.memory_space<vmem>>, vector<1x8x128xf32>,
    } else {
    }
    %c0 = arith.constant 0 : index
    %c0_1 = arith.constant 0 : index
    %3 = vector.load %arg2[%c0, %c0_1] : memref<8x256xf32, #tpu.memory_space<vmem>>, vector<8x256xf32>
    %c0_2 = arith.constant 0 : index
    %c0_3 = arith.constant 0 : index
    %c0_4 = arith.constant 0 : index
    %4 = vector.load %arg3[%c0_2, %c0_3, %c0_4] : memref<1x8x8xf32, #tpu.memory_space<vmem>>, vector<1x8x8xf32>
    %5 = vector.shape_cast %4 : vector<1x8x8xf32> to vector<8x8xf32>
    %cst = arith.constant dense<0.000000e+00> : vector<8x8xf32>
    %6 = tpu.matmul %3, %3, %cst {dimension_numbers = #tpu.dot_dimension_numbers<[1], [1], [0], [0], [0, 0, 1, 0], [], []>} : vector<8x256xf32>, vector<8x256xf32>, vector<8x8xf32> -> vector<8x8xf32>
    %7 = arith.addf %5, %6 : vector<8x8xf32>
    %c0_5 = arith.constant 0 : index
    %c0_6 = arith.constant 0 : index
    %c0_7 = arith.constant 0 : index
    %8 = vector.load %arg3[%c0_5, %c0_6, %c0_7] : memref<1x8x8xf32, #tpu.memory_space<vmem>>, vector<1x8x8xf32>
    %9 = vector.shape_cast %8 : vector<1x8x8xf32> to vector<8x8xf32>
    %10 = vector.shape_cast %7 : vector<8x8xf32> to vector<1x8x8xf32>
    tpu.vector_store %arg3[%c0_5, %c0_6, %c0_7], %10 {strides = array<i32>} : memref<1x8x8xf32, #tpu.memory_space<vmem>>, vector<1x8x8xf32>,
    %c0_8 = arith.constant 0 : index
    %c0_9 = arith.constant 0 : index
    %c0_10 = arith.constant 0 : index
    %11 = vector.load %arg4[%c0_8, %c0_9, %c0_10] : memref<1x8x128xf32, #tpu.memory_space<vmem>>, vector<1x8x128xf32>
    %12 = vector.shape_cast %11 : vector<1x8x128xf32> to vector<8x128xf32>
    %13 = vector.shape_cast %3 : vector<8x256xf32> to vector<8x2x128xf32>
    %cst_11 = arith.constant dense<0.000000e+00> : vector<8x128xf32>
    %14 = vector.multi_reduction <add>, %13, %cst_11 [1] : vector<8x2x128xf32> to vector<8x128xf32>
    %15 = arith.addf %12, %14 : vector<8x128xf32>
    %c0_12 = arith.constant 0 : index
    %c0_13 = arith.constant 0 : index
    %c0_14 = arith.constant 0 : index
    %16 = vector.load %arg4[%c0_12, %c0_13, %c0_14] : memref<1x8x128xf32, #tpu.memory_space<vmem>>, vector<1x8x128xf32>
    %17 = vector.shape_cast %16 : vector<1x8x128xf32> to vector<8x128xf32>
    %18 = vector.shape_cast %15 : vector<8x128xf32> to vector<1x8x128xf32>
    tpu.vector_store %arg4[%c0_12, %c0_13, %c0_14], %18 {strides = array<i32>} : memref<1x8x128xf32, #tpu.memory_space<vmem>>, vector<1x8x128xf32>,
    return
  }
  func.func @transform_0(%arg0: i32, %arg1: i32) -> (i32, i32) {
    %c1_i32 = arith.constant 1 : i32
    %0 = arith.muli %arg0, %c1_i32 : i32
    %1 = arith.addi %0, %arg1 : i32
    %c0_i32 = arith.constant 0 : i32
    %2 = arith.minsi %1, %c0_i32 : i32
    %c0_i32_0 = arith.constant 0 : i32
    %c0_i32_1 = arith.constant 0 : i32
    return %c0_i32_0, %2 : i32, i32
  }
  func.func @transform_1(%arg0: i32, %arg1: i32) -> (i32, i32, i32) {
    %c0_i32 = arith.constant 0 : i32
    %c0_i32_0 = arith.constant 0 : i32
    %c0_i32_1 = arith.constant 0 : i32
    return %arg0, %c0_i32, %c0_i32_0 : i32, i32, i32
  }
  func.func @transform_2(%arg0: i32, %arg1: i32) -> (i32, i32, i32) {
    %c0_i32 = arith.constant 0 : i32
    %c0_i32_0 = arith.constant 0 : i32
    %c0_i32_1 = arith.constant 0 : i32
    return %arg0, %c0_i32, %c0_i32_0 : i32, i32, i32
  }
}

</mosaic_0001>

<bundles_post_ra>
// kernel: tpu_custom_call.1
= control target key start
LH: loop header
LB: loop body
LE: loop exit
PB: predicated region body
PF: predicated region fallthrough
CT: control target
= control target key end

     0   :  { %8 = vsyncpa [#allocation3], 0  ;;  %s446_s0 = inlined_call_operand.hbm [shape: f32[8,256], index: 0, kind: input, shape index: {}]   ;;  %s447_s1 = inlined_call_operand.hbm [shape: f32[1,8,8], index: 1, kind: output, shape index: {0}]   ;;  %s448_s2 = inlined_call_operand.hbm [shape: f32[1,8,128], index: 2, kind: output, shape index: {1}]  }
   0x1   :  { %9 = vsyncpa [#allocation4], 0 }
   0x2   :  { %10 = vsyncpa [#allocation7], 0  ;;  %s379_s9 = smov [#allocation2]   ;;  %s307_s13 = scalar_lea.hbm %s446_s0, 256 }
   0x3   :  { %s23_s10 = sshll.u32 %s379_s9, 4  ;;  %p308_p0 = scmp.ne.s32.totalorder %s446_s0, %s307_s13  ;;  %s24_s10 = int_to_ptr.vmem [resolvable:$true] %s23_s10 }
   0x4   :  { %p311_p1 = scmp.lt.u32.totalorder %s307_s13, %s446_s0 }
   0x6   :  { %p313_p2 = pnand %p311_p1, %p308_p0 }
   0x8   :  { %316 = shalt.err (!%p313_p2)
}
   0x9   :  { %s317_s18 = scalar_lea.vmem %s24_s10, 256  ;;  %p322_p4 = scmp.lt.s32.totalorder %s24_s10, %s24_s10 }
   0xa   :  { %p318_p3 = scmp.ne.s32.totalorder %s24_s10, %s317_s18  ;;  %p323_p5 = scmp.lt.s32.totalorder %s317_s18, %s317_s18 }
   0xc   :  { %p324_p6 = por %p323_p5, %p322_p4 }
   0xe   :  { %p325_p7 = pnand %p324_p6, %p318_p3 }
  0x10   :  { %328 = shalt.err (!%p325_p7)
}
  0x11   :  { %26 = dma.hbm_to_vmem [thread:$0]  %s446_s0, 256, %s24_s10, [#allocation3]  }
  0x12   :  { %373 = dma.done.wait [#allocation3], 256  }
  0x13   :  { %374 = vsyncadd [#allocation3], 4294967040  ;;  %vm38_vm0 = vcmask 64512   ;;  %v380_v0 = vmov 0.0   ;;  %v42_v1 = vld [vmem:[#allocation2 + $0x8] sm:$0xff]  ;;  %v41_v2 = vld [vmem:[#allocation2] sm:$0xff]  ;;  %v130_v5 = vlaneseq }
  0x14   :  { %39 = vst.msk [vmem:[#allocation5] sm:$0xff] %vm38_vm0, %v380_v0  ;;  %44 = vmatprep.subr.mxu0 %v42_v1  ;;  %108 = vmatprep.mubr.f32.mxu0 %v42_v1  ;;  %v381_v3 = vmov 1983009808   ;;  %v382_v8 = vmov 1934713408   ;;  %v135_v11 = vcombine.high %v42_v1, %v380_v0  ;;  %v119_v12 = vcombine.high %v41_v2, %v380_v0  ;;  %s383_s0 = smov [#allocation6]  }
  0x15   :  { %45 = vmatpush1.xpose.msra.mxu0 %v41_v2  ;;  %v128_v4 = vunpack.c.l.s4 %v381_v3  ;;  %v131_v7 = vshrl.u32 %v130_v5, 7  ;;  %v153_v9 = vunpack.c.l.s4 %v382_v8  ;;  %v299_v14 = vld.sshfl [vmem:[#allocation2] sm:$0xff pattern:$0x76325410]  ;;  %vm186_vm1 = vcmask 1041408   ;;  %s284_s21 = sshll.u32 %s383_s0, 4  ;;  %s285_s21 = int_to_ptr.vmem [resolvable:$true] %s284_s21 }
  0x16   :  { %v300_v15 = vld.sshfl [vmem:[#allocation2 + $0x8] sm:$0xff pattern:$0x76325410]  ;;  %vm251_vm2 = vcmask 1041409   ;;  %vm253_vm3 = vcmask 1042434   ;;  %vm255_vm4 = vcmask 1043459   ;;  %p334_p9 = scmp.lt.s32.totalorder %s285_s21, %s285_s21 }
  0x17   :  { %v129_v6 = vunpack.c.0.s8 %v128_v4  ;;  %v154_v13 = vunpack.c.0.s8 %v153_v9  ;;  %v150_v18 = vcombine.low %v299_v14, %v300_v15  ;;  %v151_v22 = vcombine.high %v299_v14, %v300_v15  ;;  %s329_s22 = scalar_lea.vmem %s285_s21, 128 }
  0x18   :  { %109 = vmatmul.mubr.f32.vlgmr.msra.gmra.mrb[0].mxu0 %v41_v2  ;;  %vm257_vm5 = vcmask 1044484   ;;  %vm259_vm6 = vcmask 1045509   ;;  %vm261_vm7 = vcmask 1046534   ;;  %vm263_vm8 = vcmask 1047559   ;;  %p330_p8 = scmp.ne.s32.totalorder %s285_s21, %s329_s22  ;;  %p335_p10 = scmp.lt.s32.totalorder %s329_s22, %s329_s22 }
  0x19   :  { %v132_v10 = vsub.s32 %v129_v6, %v131_v7  ;;  %v157_v19 = vsub.s32 %v154_v13, %v131_v7 }
  0x1a   :  { %p336_p11 = por %p335_p10, %p334_p9 }
  0x1b   :  { %v149_v16 = vrot.slane %v135_v11, %v132_v10  ;;  %v133_v17 = vrot.slane %v119_v12, %v132_v10  ;;  %v158_v21 = vrot.slane %v150_v18, %v157_v19  ;;  %v165_v25 = vrot.slane %v151_v22, %v157_v19 }
  0x1c   :  { %p337_p12 = pnand %p336_p11, %p330_p8 }
  0x1d   :  { %v166_v20 = vcombine.low %v133_v17, %v149_v16  ;;  %v182_v24 = vcombine.high %v158_v21, %v380_v0  ;;  %v167_v26 = vcombine.high %v133_v17, %v149_v16  ;;  %v187_v27 = vsel %vm186_vm1, %v158_v21, 0.0 }
  0x1e   :  { %v188_v31 = vrot.slane %v187_v27, 4  ;;  %v201_v32 = vsel %vm186_vm1, %v165_v25, 0.0  ;;  %v183_v34 = vcombine.high %v165_v25, %v380_v0 }
  0x1f   :  { %v174_v23 = vrot.slane %v166_v20, %v157_v19  ;;  %v194_v29 = vsel %vm186_vm1, %v182_v24, 0.0  ;;  %v181_v33 = vrot.slane %v167_v26, %v157_v19  ;;  %v202_v37 = vrot.slane %v201_v32, 4 }
  0x20   :  { %v195_v36 = vrot.slane %v194_v29, 4  ;;  %v189_v39 = vadd.f32 %v188_v31, %v187_v27  ;;  %v208_v41 = vsel %vm186_vm1, %v183_v34, 0.0 }
  0x21   :  { %v215_v28 = vsel %vm186_vm1, %v174_v23, 0.0  ;;  %v184_v30 = vcombine.high %v174_v23, %v380_v0  ;;  %v229_v40 = vsel %vm186_vm1, %v181_v33, 0.0  ;;  %v185_v42 = vcombine.high %v181_v33, %v380_v0 }
  0x22   :  { %v216_v35 = vrot.slane %v215_v28, 4  ;;  %v196_v44 = vadd.f32 %v195_v36, %v194_v29  ;;  %v203_v46 = vadd.f32 %v202_v37, %v201_v32  ;;  %v230_v47 = vrot.slane %v229_v40, 4 }
  0x23   :  { %v222_v38 = vsel %vm186_vm1, %v184_v30, 0.0  ;;  %v190_v48 = vrot.slane %v189_v39, 2  ;;  %v209_v49 = vrot.slane %v208_v41, 4  ;;  %v236_v51 = vsel %vm186_vm1, %v185_v42, 0.0 }
  0x24   :  { %v217_v43 = vadd.f32 %v216_v35, %v215_v28  ;;  %v223_v45 = vrot.slane %v222_v38, 4  ;;  %v197_v52 = vrot.slane %v196_v44, 2  ;;  %v204_v54 = vrot.slane %v203_v46, 2 }
  0x25   :  { %v231_v55 = vadd.f32 %v230_v47, %v229_v40  ;;  %v191_v56 = vadd.f32 %v190_v48, %v189_v39  ;;  %v210_v57 = vadd.f32 %v209_v49, %v208_v41  ;;  %v237_v58 = vrot.slane %v236_v51, 4 }
  0x26   :  { %v218_v50 = vrot.slane %v217_v43, 2  ;;  %v224_v53 = vadd.f32 %v223_v45, %v222_v38  ;;  %v198_v60 = vadd.f32 %v197_v52, %v196_v44  ;;  %v205_v62 = vadd.f32 %v204_v54, %v203_v46 }
  0x27   :  { %v232_v63 = vrot.slane %v231_v55, 2  ;;  %v192_v0 = vrot.slane %v191_v56, 1  ;;  %v238_v1 = vadd.f32 %v237_v58, %v236_v51  ;;  %v211_v2 = vrot.slane %v210_v57, 2 }
  0x28   :  { %v219_v59 = vadd.f32 %v218_v50, %v217_v43  ;;  %v225_v61 = vrot.slane %v224_v53, 2  ;;  %v199_v5 = vrot.slane %v198_v60, 1  ;;  %v206_v8 = vrot.slane %v205_v62, 1 }
  0x29   :  { %v212_v6 = vadd.f32 %v211_v2, %v210_v57  ;;  %v233_v7 = vadd.f32 %v232_v63, %v231_v55  ;;  %v193_v9 = vadd.f32 %v192_v0, %v191_v56  ;;  %v239_v12 = vrot.slane %v238_v1, 2 }
  0x2a   :  { %v220_v3 = vrot.slane %v219_v59, 1  ;;  %v226_v4 = vadd.f32 %v225_v61, %v224_v53  ;;  %v200_v10 = vadd.f32 %v199_v5, %v198_v60  ;;  %v207_v14 = vadd.f32 %v206_v8, %v205_v62 }
  0x2b   :  { %v213_v11 = vrot.slane %v212_v6, 1  ;;  %v240_v17 = vadd.f32 %v239_v12, %v238_v1  ;;  %v234_v19 = vrot.slane %v233_v7, 1 }
  0x2c   :  { %v221_v13 = vadd.f32 %v220_v3, %v219_v59  ;;  %v227_v16 = vrot.slane %v226_v4, 1  ;;  %v252_v18 = vsel %vm251_vm2, %v200_v10, %v193_v9 }
  0x2d   :  { %v214_v15 = vadd.f32 %v213_v11, %v212_v6  ;;  %v241_v21 = vrot.slane %v240_v17, 1  ;;  %v254_v22 = vsel %vm253_vm3, %v207_v14, %v252_v18  ;;  %v235_v23 = vadd.f32 %v234_v19, %v233_v7 }
  0x2e   :  { %v228_v20 = vadd.f32 %v227_v16, %v226_v4 }
  0x2f   :  { %v256_v24 = vsel %vm255_vm4, %v214_v15, %v254_v22  ;;  %v242_v25 = vadd.f32 %v241_v21, %v240_v17 }
  0x30   :  { %v258_v26 = vsel %vm257_vm5, %v221_v13, %v256_v24 }
  0x31   :  { %v260_v27 = vsel %vm259_vm6, %v228_v20, %v258_v26 }
  0x32   :  { %v262_v28 = vsel %vm261_vm7, %v235_v23, %v260_v27 }
  0x33   :  { %v264_v29 = vsel %vm263_vm8, %v242_v25, %v262_v28 }
  0x34   :  { %267 = vst [vmem:[#allocation6] sm:$0xff] %v264_v29 }
  0x35   :  { %340 = shalt.err (!%p337_p12)
}
  0x36   :  { %s341_s25 = scalar_lea.hbm %s448_s2, 128 }
  0x37   :  { %p342_p13 = scmp.ne.s32.totalorder %s448_s2, %s341_s25  ;;  %p345_p0 = scmp.lt.u32.totalorder %s341_s25, %s448_s2 }
  0x39   :  { %p347_p1 = pnand %p345_p0, %p342_p13 }
  0x3b   :  { %350 = shalt.err (!%p347_p1)
}
  0x3c   :  { %287 = dma.vmem_to_hbm [thread:$0]  %s285_s21, 128, %s448_s2, [#allocation7]   ;;  %v43_v30 = vld [vmem:[#allocation5] sm:$0xff] }
  0x3d   :  { %s384_s4 = smov [#allocation5]  }
  0x3e   :  { %s274_s5 = sshll.u32 %s384_s4, 4  ;;  %s275_s5 = int_to_ptr.vmem [resolvable:$true] %s274_s5 }
  0x3f   :  { %s351_s6 = scalar_lea.vmem %s275_s5, 128  ;;  %p356_p3 = scmp.lt.s32.totalorder %s275_s5, %s275_s5 }
  0x40   :  { %p352_p2 = scmp.ne.s32.totalorder %s275_s5, %s351_s6  ;;  %p357_p4 = scmp.lt.s32.totalorder %s351_s6, %s351_s6 }
  0x42   :  { %p358_p5 = por %p357_p4, %p356_p3 }
  0x44   :  { %p359_p6 = pnand %p358_p5, %p352_p2 }
  0xeb   :  { %v110_v31 = vpop.f32.mrb[0].mxu0 }
  0xec   :  { %v114_v32 = vadd.f32 %v110_v31, %v43_v30  ;;  %v112_v33 = vpop.f32.mrb[1].mxu0 }
  0xee   :  { %116 = vst.msk [vmem:[#allocation5] sm:$0xff] %vm38_vm0, %v114_v32 }
  0xef   :  { %362 = shalt.err (!%p359_p6)
}
  0xf0   :  { %s363_s2 = scalar_lea.hbm %s447_s1, 128 }
  0xf1   :  { %p364_p7 = scmp.ne.s32.totalorder %s447_s1, %s363_s2  ;;  %p367_p8 = scmp.lt.u32.totalorder %s363_s2, %s447_s1 }
  0xf3   :  { %p369_p9 = pnand %p367_p8, %p364_p7 }
  0xf5   :  { %372 = shalt.err (!%p369_p9)
}
  0xf6   :  { %277 = dma.vmem_to_hbm [thread:$0]  %s275_s5, 128, %s447_s1, [#allocation4]  }
  0xf7   :  { %375 = dma.done.wait [#allocation4], 128  }
  0xf8   :  { %376 = vsyncadd [#allocation4], 4294967168 }
  0xf9   :  { %377 = dma.done.wait [#allocation7], 128  }
  0xfa   :  { %378 = vsyncadd [#allocation7], 4294967168 }
  0xfb   :  { %294 = vsyncpa [#allocation3], 1 }
  0xfc   :  { %295 = vsyncpa [#allocation4], 1 }
  0xfd   :  { %296 = vsyncpa [#allocation7], 1 }

</bundles_post_ra>
